<compile_context>
chip_gen: v7x
topology: tpu7x:2x2x1
jax: 0.10.0
libtpu: 0.0.40
codegen_flags: <defaults>
</compile_context>

<pallas_src>
import functools

import jax
import jax.numpy as jnp
from jax.experimental import pallas as pl
from jax.experimental.pallas import tpu as pltpu


def _round_up(x, m):
    return (x + m - 1) // m * m


def _align_tile_m(tm):
    # 256-aligned for the v6e/v7x 256-wide MXU, 128 for v5e, 16 for bf16 sublane
    # packing on small tiles; never below 8.
    if tm >= 256:
        return tm // 256 * 256
    if tm >= 128:
        return tm // 128 * 128
    if tm >= 16:
        return tm // 16 * 16
    return max(8, tm // 8 * 8)


@functools.lru_cache(maxsize=1)
def _default_vmem_limit_bytes():
    """~50% of this generation's per-core VMEM (leaves pipeline/scratch headroom)."""
    cap = 0
    try:
        cap = int(getattr(pltpu.get_tpu_info(), "vmem_capacity_bytes", 0) or 0)
    except Exception:
        cap = 0
    if cap <= 0:
        cap = 64 * 1024 * 1024          # conservative (v7x-sized) fallback
    return max(16 * 1024 * 1024, cap // 2)


# --------------------------------------------------------------------------- kernels
def _linear_kernel(x_ref, w_ref, b_ref, o_ref):
    # x:(tm,K) @ w:(K,N) on the MXU, f32 accumulation, +bias, cast to out dtype.
    acc = jnp.dot(x_ref[...], w_ref[...], preferred_element_type=jnp.float32)
    o_ref[...] = (acc + b_ref[...]).astype(o_ref.dtype)


def _linear_kernel_ktiled(x_ref, w_ref, b_ref, o_ref, acc_ref):
    # grid = (M tiles, K tiles); K is the reduction axis (innermost, "arbitrary").
    k = pl.program_id(1)

    @pl.when(k == 0)
    def _init():
        acc_ref[...] = jnp.zeros_like(acc_ref)

    acc_ref[...] += jnp.dot(x_ref[...], w_ref[...],
                            preferred_element_type=jnp.float32)

    @pl.when(k == pl.num_programs(1) - 1)
    def _finalize():
        o_ref[...] = (acc_ref[...] + b_ref[...]).astype(o_ref.dtype)


# --------------------------------------------------------------------------- wrapper
def prepare_slowfast_head_params(weight, bias, *, compute_dtype=None):
    """One-time parameter prep (hoisted out of the forward path).

    weight : (dim_out, dim_in)   PyTorch nn.Linear layout
    bias   : (dim_out,)
    compute_dtype : e.g. jnp.bfloat16 to run the MXU in bf16 (accumulation stays
                    f32 inside the kernel). None keeps the given weight dtype.
    """
    dim_out, dim_in = weight.shape
    n_pad = _round_up(dim_out, 128)     # lane-dense output stores / full MXU lanes
    k_pad = _round_up(dim_in, 128)      # lane-dense x loads + legal K tiling
    w_t = weight.T                      # (dim_in, dim_out)
    if compute_dtype is not None:
        w_t = w_t.astype(compute_dtype)
    if (k_pad, n_pad) != (dim_in, dim_out):
        w_t = jnp.pad(w_t, ((0, k_pad - dim_in), (0, n_pad - dim_out)))
    b = jnp.pad(bias.astype(jnp.float32).reshape(1, dim_out),
                ((0, 0), (0, n_pad - dim_out)))
    return {"w": w_t, "b": b, "dim_in": dim_in, "dim_out": dim_out}


def slowfast_head_forward(preds, params, *, tile_m=512, tile_k=None,
                          vmem_limit_bytes=None):
    """nn.Linear forward (preds @ W.T + bias) using params from
    `prepare_slowfast_head_params`. Only preds and the output move per call."""
    w, b = params["w"], params["b"]
    dim_in, dim_out = params["dim_in"], params["dim_out"]
    K, N = w.shape
    assert preds.shape[-1] == dim_in
    lead_shape = preds.shape[:-1]
    out_dtype = preds.dtype

    x = preds.reshape(-1, dim_in)
    M = x.shape[0]
    if M == 0:
        return jnp.zeros((*lead_shape, dim_out), out_dtype)

    if x.dtype != w.dtype:
        x = x.astype(w.dtype)            # e.g. f32 activations -> bf16 compute path
    if K != dim_in:                      # K was zero-padded at prep (rare; 2304 is aligned)
        x = jnp.pad(x, ((0, 0), (0, K - dim_in)))

    in_b = jnp.dtype(x.dtype).itemsize
    w_b = jnp.dtype(w.dtype).itemsize
    out_b = jnp.dtype(out_dtype).itemsize

    vmem_limit = int(vmem_limit_bytes or _default_vmem_limit_bytes())
    budget = int(0.85 * vmem_limit)      # headroom for internal pipeline scratch

    resident_w = K * N * w_b + N * 4     # single-buffered W + f32 bias
    use_k_tiling = (tile_k is not None) or (resident_w > budget // 2)

    tm_req = _align_tile_m(max(8, int(tile_m)))

    if not use_k_tiling:
        # ---- single-pass kernel: W stays resident in VMEM across the whole grid ----
        avail = max(0, budget - resident_w)
        per_row = 2 * (K * in_b + N * out_b)        # double-buffered x + out rows
        tm_cap = max(8, (avail // per_row) // 8 * 8)
        tm = _align_tile_m(min(tm_req, tm_cap))
        if tm >= M:
            tm, grid_m = M, 1                       # one full-array block (any M)
        else:
            grid_m = pl.cdiv(M, tm)                 # partial last block is clipped
        # NOTE: when grid_m == 1 the x/out blocks could also be pl.Buffered(1);
        # tiles are sized for double-buffering, so this is only extra headroom.
        out = pl.pallas_call(
            _linear_kernel,
            out_shape=jax.ShapeDtypeStruct((M, N), out_dtype),
            grid_spec=pltpu.PrefetchScalarGridSpec(
                num_scalar_prefetch=0,
                grid=(grid_m,),
                in_specs=[
                    pl.BlockSpec((tm, K), lambda i: (i, 0)),
                    # grid-invariant W / bias: a single pipeline buffer each.
                    pl.BlockSpec((K, N), lambda i: (0, 0),
                                 pipeline_mode=pl.Buffered(buffer_count=1)),
                    pl.BlockSpec((1, N), lambda i: (0, 0),
                                 pipeline_mode=pl.Buffered(buffer_count=1)),
                ],
                out_specs=pl.BlockSpec((tm, N), lambda i: (i, 0)),
            ),
            compiler_params=pltpu.CompilerParams(
                dimension_semantics=("parallel",),
                vmem_limit_bytes=vmem_limit,
            ),
        )(x, w, b)
    else:
        # ---- K-tiled kernel with an f32 VMEM accumulator (large dim_in * N) ----
        tk_req = _round_up(max(128, int(tile_k or 512)), 128)
        tk = 128
        for cand in range(min(tk_req, K) // 128, 0, -1):   # largest 128-mult divisor
            if K % (cand * 128) == 0:
                tk = cand * 128
                break
        grid_k = K // tk
        fixed = 2 * tk * N * w_b + N * 4                    # dbl-buffered W + bias
        per_row = 2 * tk * in_b + 2 * N * out_b + N * 4     # x, out, acc rows
        avail = max(0, budget - fixed)
        tm_cap = max(8, (avail // per_row) // 8 * 8)
        tm = _align_tile_m(min(tm_req, tm_cap))
        if tm >= M:
            tm, grid_m = M, 1
        else:
            grid_m = pl.cdiv(M, tm)
        out = pl.pallas_call(
            _linear_kernel_ktiled,
            out_shape=jax.ShapeDtypeStruct((M, N), out_dtype),
            grid_spec=pltpu.PrefetchScalarGridSpec(
                num_scalar_prefetch=0,
                grid=(grid_m, grid_k),
                in_specs=[
                    pl.BlockSpec((tm, tk), lambda i, k: (i, k)),
                    pl.BlockSpec((tk, N), lambda i, k: (k, 0)),
                    pl.BlockSpec((1, N), lambda i, k: (0, 0),
                                 pipeline_mode=pl.Buffered(buffer_count=1)),
                ],
                out_specs=pl.BlockSpec((tm, N), lambda i, k: (i, 0)),
                scratch_shapes=[pltpu.VMEM((tm, N), jnp.float32)],
            ),
            compiler_params=pltpu.CompilerParams(
                dimension_semantics=("parallel", "arbitrary"),
                vmem_limit_bytes=vmem_limit,
            ),
        )(x, w, b)

    if N != dim_out:
        out = out[:, :dim_out]
    return out.reshape(*lead_shape, dim_out)


if __name__ == "__main__":
    key = jax.random.PRNGKey(0)
    k_x, k_w, k_b, k_x2, k_w2, k_b2 = jax.random.split(key, 6)

    # --- Test 1: small f32 head (batch=2, dim_in=32, dim_out=16) ---------------
    batch, dim_in, dim_out = 2, 32, 16
    x = jax.random.normal(k_x, (batch, dim_in), dtype=jnp.float32)
    bound = 1.0 / (dim_in ** 0.5)
    weight = jax.random.uniform(k_w, (dim_out, dim_in), jnp.float32, -bound, bound)
    bias = jax.random.uniform(k_b, (dim_out,), jnp.float32, -bound, bound)

    params = prepare_slowfast_head_params(weight, bias)     # one-time prep
    y = jax.block_until_ready(slowfast_head_forward(x, params))
    y_ref = x @ weight.T + bias
    assert y.shape == (batch, dim_out)
    assert y.dtype == x.dtype
    assert jnp.allclose(y, y_ref, atol=1e-5, rtol=1e-5)

    # --- Test 2: bf16 compute path, multi-dim leading shape --------------------
    params_bf16 = prepare_slowfast_head_params(weight, bias,
                                               compute_dtype=jnp.bfloat16)
    x2 = jax.random.normal(k_x2, (2, 5, dim_in), dtype=jnp.float32)
    y2 = jax.block_until_ready(slowfast_head_forward(x2, params_bf16))
    y2_ref = x2 @ weight.T + bias
    assert y2.shape == (2, 5, dim_out)
    assert jnp.allclose(y2, y2_ref, atol=5e-2, rtol=5e-2)

    # --- Test 3: tiled M with a ragged (partial) last block --------------------
    x3 = jax.random.normal(k_x, (20, dim_in), dtype=jnp.float32)
    y3 = jax.block_until_ready(slowfast_head_forward(x3, params, tile_m=8))
    y3_ref = x3 @ weight.T + bias
    assert y3.shape == (20, dim_out)
    assert jnp.allclose(y3, y3_ref, atol=1e-5, rtol=1e-5)

    # --- Test 4: K-tiled accumulator path (larger dim_in, forced via tile_k) ---
    dim_in4, dim_out4, batch4 = 256, 10, 4
    x4 = jax.random.normal(k_x2, (batch4, dim_in4), dtype=jnp.float32)
    bound4 = 1.0 / (dim_in4 ** 0.5)
    w4 = jax.random.uniform(k_w2, (dim_out4, dim_in4), jnp.float32, -bound4, bound4)
    b4 = jax.random.uniform(k_b2, (dim_out4,), jnp.float32, -bound4, bound4)
    params4 = prepare_slowfast_head_params(w4, b4)
    y4 = jax.block_until_ready(slowfast_head_forward(x4, params4, tile_k=128))
    y4_ref = x4 @ w4.T + b4
    assert y4.shape == (batch4, dim_out4)
    assert jnp.allclose(y4, y4_ref, atol=1e-4, rtol=1e-4)

    print("KERNEL_OK")
</pallas_src>

<mosaic_0001>
module attributes {stable_mosaic.version = 11 : i64} {
  func.func @_linear_kernel(%arg0: i32, %arg1: memref<2x128xf32, #tpu.memory_space<vmem>>, %arg2: memref<128x128xf32, #tpu.memory_space<vmem>>, %arg3: memref<1x128xf32, #tpu.memory_space<vmem>>, %arg4: memref<2x128xf32, #tpu.memory_space<vmem>>) attributes {dimension_semantics = [#tpu.dimension_semantics<parallel>], iteration_bounds = array<i64: 1>, scalar_prefetch = 0 : i64, scratch_operands = 0 : i64, tpu.core_type = #tpu.core_type<tc>, window_params = [{transform_indices = @transform_0, window_bounds = array<i64: 2, 128>}, {pipeline_mode = #tpu.pipeline_mode<synchronous>, transform_indices = @transform_1, window_bounds = array<i64: 128, 128>}, {pipeline_mode = #tpu.pipeline_mode<synchronous>, transform_indices = @transform_2, window_bounds = array<i64: 1, 128>}, {transform_indices = @transform_3, window_bounds = array<i64: 2, 128>}]} {
    %c0 = arith.constant 0 : index
    %c0_0 = arith.constant 0 : index
    %0 = vector.load %arg1[%c0, %c0_0] : memref<2x128xf32, #tpu.memory_space<vmem>>, vector<2x128xf32>
    %c0_1 = arith.constant 0 : index
    %c0_2 = arith.constant 0 : index
    %1 = vector.load %arg2[%c0_1, %c0_2] : memref<128x128xf32, #tpu.memory_space<vmem>>, vector<128x128xf32>
    %cst = arith.constant dense<0.000000e+00> : vector<2x128xf32>
    %2 = tpu.matmul %0, %1, %cst {dimension_numbers = #tpu.dot_dimension_numbers<[1], [0], [0], [1], [0, 0, 1, 1], [], []>} : vector<2x128xf32>, vector<128x128xf32>, vector<2x128xf32> -> vector<2x128xf32>
    %c0_3 = arith.constant 0 : index
    %c0_4 = arith.constant 0 : index
    %3 = vector.load %arg3[%c0_3, %c0_4] : memref<1x128xf32, #tpu.memory_space<vmem>>, vector<1x128xf32>
    %4 = vector.broadcast %3 : vector<1x128xf32> to vector<2x128xf32>
    %5 = arith.addf %2, %4 : vector<2x128xf32>
    %c0_5 = arith.constant 0 : index
    %c0_6 = arith.constant 0 : index
    %6 = vector.load %arg4[%c0_5, %c0_6] : memref<2x128xf32, #tpu.memory_space<vmem>>, vector<2x128xf32>
    tpu.vector_store %arg4[%c0_5, %c0_6], %5 {strides = array<i32>} : memref<2x128xf32, #tpu.memory_space<vmem>>, vector<2x128xf32>,
    return
  }
  func.func @transform_0(%arg0: i32) -> (i32, i32) {
    %c0_i32 = arith.constant 0 : i32
    %c0_i32_0 = arith.constant 0 : i32
    return %arg0, %c0_i32 : i32, i32
  }
  func.func @transform_1(%arg0: i32) -> (i32, i32) {
    %c0_i32 = arith.constant 0 : i32
    %c0_i32_0 = arith.constant 0 : i32
    %c0_i32_1 = arith.constant 0 : i32
    return %c0_i32, %c0_i32_0 : i32, i32
  }
  func.func @transform_2(%arg0: i32) -> (i32, i32) {
    %c0_i32 = arith.constant 0 : i32
    %c0_i32_0 = arith.constant 0 : i32
    %c0_i32_1 = arith.constant 0 : i32
    return %c0_i32, %c0_i32_0 : i32, i32
  }
  func.func @transform_3(%arg0: i32) -> (i32, i32) {
    %c0_i32 = arith.constant 0 : i32
    %c0_i32_0 = arith.constant 0 : i32
    return %arg0, %c0_i32 : i32, i32
  }
}

</mosaic_0001>

<bundles_post_ra>
// kernel: tpu_custom_call.1
= control target key start
LH: loop header
LB: loop body
LE: loop exit
PB: predicated region body
PF: predicated region fallthrough
CT: control target
= control target key end

     0   :  { %8 = vsyncpa [#allocation3], 0  ;;  %s383_s0 = inlined_call_operand.hbm [shape: f32[2,128], index: 0, kind: input, shape index: {}]   ;;  %s384_s1 = inlined_call_operand.hbm [shape: f32[128,128], index: 1, kind: input, shape index: {}]   ;;  %s385_s2 = inlined_call_operand.vmem [shape: f32[1,128], index: 2, kind: input, shape index: {}]   ;;  %s386_s3 = inlined_call_operand.hbm [shape: f32[2,128], index: 3, kind: output, shape index: {}]  }
   0x1   :  { %9 = vsyncpa [#allocation6], 0 }
   0x2   :  { %10 = vsyncpa [#allocation4], 0  ;;  %s309_s12 = smov [#allocation2]   ;;  %s310_s14 = smov [#allocation5]  }
   0x3   :  { %s17_s13 = sshll.u32 %s309_s12, 4  ;;  %s26_s15 = sshll.u32 %s310_s14, 4  ;;  %s18_s13 = int_to_ptr.vmem [resolvable:$true] %s17_s13  ;;  %s337_s15 = int_to_ptr.vmem [resolvable:$true] %s26_s15 }
   0x4   :  { %s237_s18 = scalar_lea.hbm %s383_s0, 32 }
   0x5   :  { %p238_p0 = scmp.ne.s32.totalorder %s383_s0, %s237_s18  ;;  %p241_p1 = scmp.lt.u32.totalorder %s237_s18, %s383_s0 }
   0x7   :  { %p243_p2 = pnand %p241_p1, %p238_p0 }
   0x9   :  { %246 = shalt.err (!%p243_p2)
}
   0xa   :  { %s247_s23 = scalar_lea.vmem %s18_s13, 32  ;;  %p252_p4 = scmp.lt.s32.totalorder %s18_s13, %s18_s13 }
   0xb   :  { %p248_p3 = scmp.ne.s32.totalorder %s18_s13, %s247_s23  ;;  %p253_p5 = scmp.lt.s32.totalorder %s247_s23, %s247_s23 }
   0xd   :  { %p254_p6 = por %p253_p5, %p252_p4 }
   0xf   :  { %p255_p7 = pnand %p254_p6, %p248_p3 }
  0x11   :  { %258 = shalt.err (!%p255_p7)
}
  0x12   :  { %20 = dma.hbm_to_vmem [thread:$0]  %s383_s0, 32, %s18_s13, [#allocation3]  }
  0x13   :  { %s259_s28 = scalar_lea.hbm %s384_s1, 2048 }
  0x14   :  { %p260_p8 = scmp.ne.s32.totalorder %s384_s1, %s259_s28  ;;  %p263_p9 = scmp.lt.u32.totalorder %s259_s28, %s384_s1 }
  0x16   :  { %p265_p10 = pnand %p263_p9, %p260_p8 }
  0x18   :  { %268 = shalt.err (!%p265_p10)
}
  0x19   :  { %s269_s6 = scalar_lea.vmem %s337_s15, 2048  ;;  %p274_p12 = scmp.lt.s32.totalorder %s337_s15, %s337_s15 }
  0x1a   :  { %p270_p11 = scmp.ne.s32.totalorder %s337_s15, %s269_s6  ;;  %p275_p13 = scmp.lt.s32.totalorder %s269_s6, %s269_s6 }
  0x1c   :  { %p276_p0 = por %p275_p13, %p274_p12 }
  0x1e   :  { %p277_p1 = pnand %p276_p0, %p270_p11 }
  0x20   :  { %280 = shalt.err (!%p277_p1)
}
  0x21   :  { %s311_s0 = smov 128   ;;  %s312_s7 = smov 8  }
  0x22   :  { %32 = dma.hbm_to_vmem [thread:$0]  %s384_s1, 2048, %s337_s15, [#allocation6], %s311_s0, %s311_s0, %s312_s7  }
  0x23   :  { %303 = dma.done.wait [#allocation3], 32  }
  0x24   :  { %304 = vsyncadd [#allocation3], 4294967264 }
  0x25   :  { %305 = dma.done.wait [#allocation6], 2048  }
  0x26   :  { %306 = vsyncadd [#allocation6], 4294965248  ;;  %v313_v0 = vmov 0.0|0.0   ;;  %vm314_vm0 = vmmov 0   ;;  %v315_v1 = vmov 0.0   ;;  %v42_v2 = vld [vmem:[#allocation5] sm:$0xff] }
  0x27   :  { %205 = vmatprep.subr.bf16.mxu0 %v313_v0  ;;  %202 = vmatprep.mubr.msk.f32.mxu0 %vm314_vm0, %v315_v1  ;;  %v43_v3 = vld [vmem:[#allocation5 + $0x8] sm:$0xff]  ;;  %v44_v4 = vld [vmem:[#allocation5 + $0x10] sm:$0xff]  ;;  %v45_v6 = vld [vmem:[#allocation5 + $0x18] sm:$0xff]  ;;  %s316_s11 = smov [#allocation7]  }
  0x28   :  { %v206_v5 = vpack.c.bf16 %v43_v3, %v42_v2  ;;  %v209_v7 = vpack.c.bf16 %v45_v6, %v44_v4  ;;  %v46_v8 = vld [vmem:[#allocation5 + $0x20] sm:$0xff]  ;;  %v47_v9 = vld [vmem:[#allocation5 + $0x28] sm:$0xff]  ;;  %v48_v11 = vld [vmem:[#allocation5 + $0x30] sm:$0xff]  ;;  %s142_s12 = sshll.u32 %s316_s11, 4  ;;  %s143_s12 = int_to_ptr.vmem [resolvable:$true] %s142_s12 }
  0x29   :  { %v212_v10 = vpack.c.bf16 %v47_v9, %v46_v8  ;;  %v49_v12 = vld [vmem:[#allocation5 + $0x38] sm:$0xff]  ;;  %v50_v14 = vld [vmem:[#allocation5 + $0x40] sm:$0xff]  ;;  %v51_v15 = vld [vmem:[#allocation5 + $0x48] sm:$0xff]  ;;  %s281_s13 = scalar_lea.vmem %s143_s12, 32  ;;  %p286_p3 = scmp.lt.s32.totalorder %s143_s12, %s143_s12 }
  0x2a   :  { %207 = vmatpush3.bf16.msra.mxu0 %v206_v5  ;;  %v215_v13 = vpack.c.bf16 %v49_v12, %v48_v11  ;;  %v218_v16 = vpack.c.bf16 %v51_v15, %v50_v14  ;;  %v52_v17 = vld [vmem:[#allocation5 + $0x50] sm:$0xff]  ;;  %v53_v18 = vld [vmem:[#allocation5 + $0x58] sm:$0xff]  ;;  %v54_v20 = vld [vmem:[#allocation5 + $0x60] sm:$0xff]  ;;  %p282_p2 = scmp.ne.s32.totalorder %s143_s12, %s281_s13  ;;  %p287_p4 = scmp.lt.s32.totalorder %s281_s13, %s281_s13 }
  0x2b   :  { %208 = vmatprep.subr.bf16.mxu0 %v313_v0  ;;  %v221_v19 = vpack.c.bf16 %v53_v18, %v52_v17  ;;  %v55_v21 = vld [vmem:[#allocation5 + $0x68] sm:$0xff]  ;;  %v56_v23 = vld [vmem:[#allocation5 + $0x70] sm:$0xff]  ;;  %v57_v24 = vld [vmem:[#allocation5 + $0x78] sm:$0xff] }
  0x2c   :  { %v224_v22 = vpack.c.bf16 %v55_v21, %v54_v20  ;;  %v227_v25 = vpack.c.bf16 %v57_v24, %v56_v23  ;;  %v41_v26 = vld [vmem:[#allocation2] sm:$0x3]  ;;  %p288_p5 = por %p287_p4, %p286_p3 }
  0x2d   :  { %v152_v27 = vld [vmem:[%s385_s2] ss:$0 sm:$0xff] }
  0x2e   :  { %210 = vmatpush3.bf16.msra.mxu0 %v209_v7  ;;  %p289_p6 = pnand %p288_p5, %p282_p2 }
  0x2f   :  { %211 = vmatprep.subr.bf16.mxu0 %v313_v0 }
  0x32   :  { %213 = vmatpush3.bf16.msra.mxu0 %v212_v10 }
  0x33   :  { %214 = vmatprep.subr.bf16.mxu0 %v313_v0 }
  0x36   :  { %216 = vmatpush3.bf16.msra.mxu0 %v215_v13 }
  0x37   :  { %217 = vmatprep.subr.bf16.mxu0 %v313_v0 }
  0x3a   :  { %219 = vmatpush3.bf16.msra.mxu0 %v218_v16 }
  0x3b   :  { %220 = vmatprep.subr.bf16.mxu0 %v313_v0 }
  0x3e   :  { %222 = vmatpush3.bf16.msra.mxu0 %v221_v19 }
  0x3f   :  { %223 = vmatprep.subr.bf16.mxu0 %v313_v0 }
  0x42   :  { %225 = vmatpush3.bf16.msra.mxu0 %v224_v22 }
  0x43   :  { %226 = vmatprep.subr.bf16.mxu0 %v313_v0 }
  0x46   :  { %228 = vmatpush3.bf16.msra.mxu0 %v227_v25 }
  0x49   :  { %203 = vmatmul.mubr.f32.vlgmr.msra.gmra.mrb[0].mxu0 %v41_v26 }
 0x11c   :  { %v131_v28 = vpop.f32.mrb[0].mxu0 }
 0x11d   :  { %v132_v29 = vadd.f32 %v152_v27, %v131_v28  ;;  %v204_v30 = vpop.f32.mrb[1].mxu0 }
 0x11f   :  { %135 = vst [vmem:[#allocation7] sm:$0x3] %v132_v29 }
 0x120   :  { %292 = shalt.err (!%p289_p6)
}
 0x121   :  { %s293_s16 = scalar_lea.hbm %s386_s3, 32 }
 0x122   :  { %p294_p7 = scmp.ne.s32.totalorder %s386_s3, %s293_s16  ;;  %p297_p8 = scmp.lt.u32.totalorder %s293_s16, %s386_s3 }
 0x124   :  { %p299_p9 = pnand %p297_p8, %p294_p7 }
 0x126   :  { %302 = shalt.err (!%p299_p9)
}
 0x127   :  { %145 = dma.vmem_to_hbm [thread:$0]  %s143_s12, 32, %s386_s3, [#allocation4]  }
 0x128   :  { %307 = dma.done.wait [#allocation4], 32  }
 0x129   :  { %308 = vsyncadd [#allocation4], 4294967264 }
 0x12a   :  { %149 = vsyncpa [#allocation3], 1 }
 0x12b   :  { %150 = vsyncpa [#allocation6], 1 }
 0x12c   :  { %151 = vsyncpa [#allocation4], 1 }

</bundles_post_ra>
